<compile_context>
chip_gen: v6e
topology: v6e:2x2x1
jax: 0.10.0
libtpu: 0.0.40
codegen_flags: <defaults>
</compile_context>

<pallas_src>
import math

import jax
import jax.numpy as jnp
from jax.experimental import pallas as pl
from jax.experimental.pallas import tpu as pltpu


def _dense_block_kernel(x_ref, wa_ref, wb_ref, b_ref, o_ref, halo_ref):
    """One (Bt, tT) tile of one DenseBlock layer.

    x_ref:    (Bt, tT, Di)        input tile (f32)
    wa_ref:   (Di, 2*Do)          fused tap-0 weights (acts on x[t-d]), compute dtype
    wb_ref:   (Di, 2*Do)          fused tap-1 weights (acts on x[t]),   compute dtype
    b_ref:    (1, 2*Do)           fused bias (f32)
    o_ref:    (Bt, tT, Di+Do)     output tile
    halo_ref: (Bt, d, 2*Do) f32   last d rows of P from previous T tiles (scratch)
    """
    t_idx = pl.program_id(1)
    bt, t_tile, di = x_ref.shape
    _, d, two_do = halo_ref.shape
    do = two_do // 2

    x = x_ref[...]                                     # (Bt, tT, Di) f32
    xc = x.reshape(bt * t_tile, di).astype(wa_ref.dtype)

    # Two fused MXU matmuls (both branches at once), f32 accumulation.
    p = jnp.dot(xc, wa_ref[...],
                preferred_element_type=jnp.float32).reshape(bt, t_tile, two_do)
    q = jnp.dot(xc, wb_ref[...],
                preferred_element_type=jnp.float32).reshape(bt, t_tile, two_do)

    # Causal shift of the tap-0 branch via the carried halo (zeros at t==0).
    @pl.when(t_idx == 0)
    def _():
        halo_ref[...] = jnp.zeros_like(halo_ref)

    c = jnp.concatenate([halo_ref[...], p], axis=1)    # (Bt, d + tT, 2*Do)
    p_shifted = c[:, :t_tile, :]                       # P rows [t0-d, t0+tT-d)
    halo_ref[...] = c[:, t_tile:, :]                   # P rows [t0+tT-d, t0+tT)

    pre = p_shifted + q + b_ref[...]                   # (Bt, tT, 2*Do) f32
    gated = jnp.tanh(pre[:, :, :do]) * jax.nn.sigmoid(pre[:, :, do:])

    # Two slice writes instead of a register-level lane concat.
    o_ref[:, :, :di] = x
    o_ref[:, :, di:] = gated.astype(o_ref.dtype)


def _vmem_limit_bytes():
    """Generation-aware scoped-VMEM limit (3/4 of physical, capped)."""
    default = 48 * 1024 * 1024
    try:
        cap = int(getattr(pltpu.get_tpu_info(), "vmem_capacity_bytes", 0))
    except Exception:
        cap = 0
    if cap <= 0:
        return default
    return int(min(cap * 3 // 4, 100 * 1024 * 1024))


def _pick_time_tile(T, requested=None, target_rows=1024):
    if requested is not None:
        assert T % requested == 0, (T, requested)
        return requested
    if T <= target_rows:
        return T
    t = target_rows - (target_rows % 8)
    while t >= 8:
        if T % t == 0:
            return t
        t -= 8
    return T


def _pick_batch_tile(B, t_tile, c_in, requested=None, target_bytes=1 << 20):
    if requested is not None:
        assert B % requested == 0, (B, requested)
        return requested
    best = 1
    for bt in range(1, B + 1):
        if B % bt:
            continue
        if B >= 2 and B // bt < 2:
            break  # keep >=2 parallel grid steps for megacore
        best = bt
        if bt * t_tile * c_in * 4 >= target_bytes:
            break
    return best


def dense_block(x, w1, b1, w2, b2, dilation, *, compute_dtype=jnp.bfloat16,
                block_t=None, block_b=None):
    """One DenseBlock layer.  x: (B,T,Di) f32.  w*: (Do,Di,2) Conv1d weights.  b*: (Do,)."""
    B, T, Di = x.shape
    Do = w1.shape[0]

    # Fuse both branches + pre-transpose ONCE in plain JAX (no in-kernel .T).
    # Conv1d tap 0 acts on x[t-d], tap 1 on x[t].
    wa = jnp.concatenate([w1[:, :, 0], w2[:, :, 0]], axis=0).T.astype(compute_dtype)
    wb = jnp.concatenate([w1[:, :, 1], w2[:, :, 1]], axis=0).T.astype(compute_dtype)
    bias = jnp.concatenate([b1, b2]).reshape(1, 2 * Do).astype(jnp.float32)

    tT = _pick_time_tile(T, block_t)
    Bt = _pick_batch_tile(B, tT, Di, block_b)
    grid = (B // Bt, T // tT)

    out = pl.pallas_call(
        _dense_block_kernel,
        out_shape=jax.ShapeDtypeStruct((B, T, Di + Do), x.dtype),
        grid_spec=pltpu.PrefetchScalarGridSpec(
            num_scalar_prefetch=0,
            grid=grid,
            in_specs=[
                pl.BlockSpec((Bt, tT, Di), lambda b, t: (b, t, 0)),
                pl.BlockSpec((Di, 2 * Do), lambda b, t: (0, 0)),
                pl.BlockSpec((Di, 2 * Do), lambda b, t: (0, 0)),
                pl.BlockSpec((1, 2 * Do), lambda b, t: (0, 0)),
            ],
            out_specs=pl.BlockSpec((Bt, tT, Di + Do), lambda b, t: (b, t, 0)),
            scratch_shapes=[pltpu.VMEM((Bt, dilation, 2 * Do), jnp.float32)],
        ),
        compiler_params=pltpu.CompilerParams(
            dimension_semantics=("parallel", "arbitrary"),
            vmem_limit_bytes=_vmem_limit_bytes(),
        ),
    )(x, wa, wb, bias)
    return out


def tc_block(x, params, *, compute_dtype=jnp.bfloat16, block_t=None, block_b=None):
    """TCBlock forward: sequentially apply DenseBlocks with dilation 2**layer."""
    out = x
    for layer, (w1, b1, w2, b2) in enumerate(params):
        out = dense_block(out, w1, b1, w2, b2, dilation=2 ** layer,
                          compute_dtype=compute_dtype,
                          block_t=block_t, block_b=block_b)
    return out


# ----------------------------- pure-JAX reference -----------------------------
def dense_block_ref(x, w1, b1, w2, b2, dilation):
    B, T, Di = x.shape
    hi = jax.lax.Precision.HIGHEST
    x_prev = jnp.concatenate(
        [jnp.zeros((B, dilation, Di), x.dtype), x], axis=1)[:, :T, :]

    def branch(w, b):
        return (jnp.einsum('btd,od->bto', x_prev, w[:, :, 0], precision=hi)
                + jnp.einsum('btd,od->bto', x, w[:, :, 1], precision=hi) + b)

    gated = jnp.tanh(branch(w1, b1)) * jax.nn.sigmoid(branch(w2, b2))
    return jnp.concatenate([x, gated], axis=-1)


def tc_block_ref(x, params):
    out = x
    for layer, (w1, b1, w2, b2) in enumerate(params):
        out = dense_block_ref(out, w1, b1, w2, b2, 2 ** layer)
    return out


if __name__ == "__main__":
    B, T = 2, 16
    channel_dim, n_filters, n_layers = 4, 8, 4     # dilations 1, 2, 4, 8

    key = jax.random.PRNGKey(0)
    key, kx = jax.random.split(key)
    x = jax.random.normal(kx, (B, T, channel_dim), dtype=jnp.float32)

    params = []
    c_in = channel_dim
    for _ in range(n_layers):
        key, k1, k2, k3, k4 = jax.random.split(key, 5)
        scale = 1.0 / math.sqrt(c_in * 2)          # Conv1d default init range
        w1 = jax.random.uniform(k1, (n_filters, c_in, 2), jnp.float32, -scale, scale)
        b1 = jax.random.uniform(k2, (n_filters,), jnp.float32, -scale, scale)
        w2 = jax.random.uniform(k3, (n_filters, c_in, 2), jnp.float32, -scale, scale)
        b2 = jax.random.uniform(k4, (n_filters,), jnp.float32, -scale, scale)
        params.append((w1, b1, w2, b2))
        c_in += n_filters

    ref = tc_block_ref(x, params)
    expected_shape = (B, T, channel_dim + n_layers * n_filters)

    # Exact-math path (f32 MXU) — validates shift/halo/gating/concat logic,
    # with block_t=8 so the T-tiling + halo carry across tiles is exercised.
    out_f32 = jax.block_until_ready(
        tc_block(x, params, compute_dtype=jnp.float32, block_t=8))
    assert out_f32.shape == expected_shape, out_f32.shape
    err = float(jnp.max(jnp.abs(out_f32 - ref)))
    assert err < 1e-3, err

    # bf16 MXU fast path (production default) — looser tolerance for bf16 rounding.
    out_bf16 = jax.block_until_ready(tc_block(x, params, block_t=8))
    assert out_bf16.shape == expected_shape, out_bf16.shape
    err_bf = float(jnp.max(jnp.abs(out_bf16 - ref)))
    assert err_bf < 1e-1, err_bf

    print("KERNEL_OK")
</pallas_src>

<mosaic_0001>
module attributes {stable_mosaic.version = 11 : i64} {
  func.func @_dense_block_kernel(%arg0: i32, %arg1: i32, %arg2: memref<1x8x4xf32, #tpu.memory_space<vmem>>, %arg3: memref<4x16xf32, #tpu.memory_space<vmem>>, %arg4: memref<4x16xf32, #tpu.memory_space<vmem>>, %arg5: memref<1x16xf32, #tpu.memory_space<vmem>>, %arg6: memref<1x8x12xf32, #tpu.memory_space<vmem>>, %arg7: memref<1x1x16xf32, #tpu.memory_space<vmem>>) attributes {dimension_semantics = [#tpu.dimension_semantics<parallel>, #tpu.dimension_semantics<arbitrary>], iteration_bounds = array<i64: 2, 2>, scalar_prefetch = 0 : i64, scratch_operands = 1 : i64, tpu.core_type = #tpu.core_type<tc>, window_params = [{transform_indices = @transform_0, window_bounds = array<i64: 1, 8, 4>}, {pipeline_mode = #tpu.pipeline_mode<synchronous>, transform_indices = @transform_1, window_bounds = array<i64: 4, 16>}, {pipeline_mode = #tpu.pipeline_mode<synchronous>, transform_indices = @transform_2, window_bounds = array<i64: 4, 16>}, {pipeline_mode = #tpu.pipeline_mode<synchronous>, transform_indices = @transform_3, window_bounds = array<i64: 1, 16>}, {transform_indices = @transform_4, window_bounds = array<i64: 1, 8, 12>}]} {
    %c0 = arith.constant 0 : index
    %c0_0 = arith.constant 0 : index
    %c0_1 = arith.constant 0 : index
    %0 = vector.load %arg2[%c0, %c0_0, %c0_1] : memref<1x8x4xf32, #tpu.memory_space<vmem>>, vector<1x8x4xf32>
    %1 = vector.shape_cast %0 : vector<1x8x4xf32> to vector<8x4xf32>
    %c0_2 = arith.constant 0 : index
    %c0_3 = arith.constant 0 : index
    %2 = vector.load %arg3[%c0_2, %c0_3] : memref<4x16xf32, #tpu.memory_space<vmem>>, vector<4x16xf32>
    %cst = arith.constant dense<0.000000e+00> : vector<8x16xf32>
    %3 = tpu.matmul %1, %2, %cst {dimension_numbers = #tpu.dot_dimension_numbers<[1], [0], [0], [1], [0, 0, 1, 1], [], []>} : vector<8x4xf32>, vector<4x16xf32>, vector<8x16xf32> -> vector<8x16xf32>
    %4 = vector.shape_cast %3 : vector<8x16xf32> to vector<1x8x16xf32>
    %c0_4 = arith.constant 0 : index
    %c0_5 = arith.constant 0 : index
    %5 = vector.load %arg4[%c0_4, %c0_5] : memref<4x16xf32, #tpu.memory_space<vmem>>, vector<4x16xf32>
    %cst_6 = arith.constant dense<0.000000e+00> : vector<8x16xf32>
    %6 = tpu.matmul %1, %5, %cst_6 {dimension_numbers = #tpu.dot_dimension_numbers<[1], [0], [0], [1], [0, 0, 1, 1], [], []>} : vector<8x4xf32>, vector<4x16xf32>, vector<8x16xf32> -> vector<8x16xf32>
    %7 = vector.shape_cast %6 : vector<8x16xf32> to vector<1x8x16xf32>
    %c0_i32 = arith.constant 0 : i32
    %8 = arith.cmpi eq, %arg1, %c0_i32 : i32
    %9 = arith.extui %8 : i1 to i32
    %c0_i32_7 = arith.constant 0 : i32
    %10 = arith.cmpi ne, %9, %c0_i32_7 : i32
    scf.if %10 {
      %cst_22 = arith.constant 0.000000e+00 : f32
      %32 = vector.broadcast %cst_22 : f32 to vector<1x1x16xf32>
      %c0_23 = arith.constant 0 : index
      %c0_24 = arith.constant 0 : index
      %c0_25 = arith.constant 0 : index
      %33 = vector.load %arg7[%c0_23, %c0_24, %c0_25] : memref<1x1x16xf32, #tpu.memory_space<vmem>>, vector<1x1x16xf32>
      tpu.vector_store %arg7[%c0_23, %c0_24, %c0_25], %32 {strides = array<i32>} : memref<1x1x16xf32, #tpu.memory_space<vmem>>, vector<1x1x16xf32>,
    } else {
    }
    %c0_8 = arith.constant 0 : index
    %c0_9 = arith.constant 0 : index
    %c0_10 = arith.constant 0 : index
    %11 = vector.load %arg7[%c0_8, %c0_9, %c0_10] : memref<1x1x16xf32, #tpu.memory_space<vmem>>, vector<1x1x16xf32>
    %12 = tpu.concatenate %11, %4 in 1 : vector<1x1x16xf32>, vector<1x8x16xf32> -> vector<1x9x16xf32>
    %13 = vector.extract_strided_slice %12 {offsets = [0, 0, 0], sizes = [1, 8, 16], strides = [1, 1, 1]} : vector<1x9x16xf32> to vector<1x8x16xf32>
    %14 = vector.extract_strided_slice %12 {offsets = [0, 8, 0], sizes = [1, 1, 16], strides = [1, 1, 1]} : vector<1x9x16xf32> to vector<1x1x16xf32>
    %c0_11 = arith.constant 0 : index
    %c0_12 = arith.constant 0 : index
    %c0_13 = arith.constant 0 : index
    %15 = vector.load %arg7[%c0_11, %c0_12, %c0_13] : memref<1x1x16xf32, #tpu.memory_space<vmem>>, vector<1x1x16xf32>
    tpu.vector_store %arg7[%c0_11, %c0_12, %c0_13], %14 {strides = array<i32>} : memref<1x1x16xf32, #tpu.memory_space<vmem>>, vector<1x1x16xf32>,
    %16 = arith.addf %13, %7 : vector<1x8x16xf32>
    %c0_14 = arith.constant 0 : index
    %c0_15 = arith.constant 0 : index
    %17 = vector.load %arg5[%c0_14, %c0_15] : memref<1x16xf32, #tpu.memory_space<vmem>>, vector<1x16xf32>
    %18 = vector.shape_cast %17 : vector<1x16xf32> to vector<1x1x16xf32>
    %19 = vector.broadcast %18 : vector<1x1x16xf32> to vector<1x8x16xf32>
    %20 = arith.addf %16, %19 : vector<1x8x16xf32>
    %21 = vector.extract_strided_slice %20 {offsets = [0, 0, 0], sizes = [1, 8, 8], strides = [1, 1, 1]} : vector<1x8x16xf32> to vector<1x8x8xf32>
    %22 = math.tanh %21 : vector<1x8x8xf32>
    %23 = vector.extract_strided_slice %20 {offsets = [0, 0, 8], sizes = [1, 8, 8], strides = [1, 1, 1]} : vector<1x8x16xf32> to vector<1x8x8xf32>
    %24 = arith.negf %23 : vector<1x8x8xf32>
    %25 = math.exp %24 : vector<1x8x8xf32>
    %cst_16 = arith.constant 1.000000e+00 : f32
    %26 = vector.broadcast %cst_16 : f32 to vector<1x8x8xf32>
    %27 = arith.addf %26, %25 : vector<1x8x8xf32>
    %28 = arith.divf %26, %27 : vector<1x8x8xf32>
    %29 = arith.mulf %22, %28 : vector<1x8x8xf32>
    %c0_17 = arith.constant 0 : index
    %c0_18 = arith.constant 0 : index
    %c0_19 = arith.constant 0 : index
    %30 = vector.load %arg6[%c0_17, %c0_18, %c0_19] : memref<1x8x12xf32, #tpu.memory_space<vmem>>, vector<1x8x4xf32>
    tpu.vector_store %arg6[%c0_17, %c0_18, %c0_19], %0 {strides = array<i32>} : memref<1x8x12xf32, #tpu.memory_space<vmem>>, vector<1x8x4xf32>,
    %c0_20 = arith.constant 0 : index
    %c0_21 = arith.constant 0 : index
    %c4 = arith.constant 4 : index
    %31 = vector.load %arg6[%c0_20, %c0_21, %c4] : memref<1x8x12xf32, #tpu.memory_space<vmem>>, vector<1x8x8xf32>
    tpu.vector_store %arg6[%c0_20, %c0_21, %c4], %29 {strides = array<i32>} : memref<1x8x12xf32, #tpu.memory_space<vmem>>, vector<1x8x8xf32>,
    return
  }
  func.func @transform_0(%arg0: i32, %arg1: i32) -> (i32, i32, i32) {
    %c0_i32 = arith.constant 0 : i32
    %c0_i32_0 = arith.constant 0 : i32
    return %arg0, %arg1, %c0_i32 : i32, i32, i32
  }
  func.func @transform_1(%arg0: i32, %arg1: i32) -> (i32, i32) {
    %c0_i32 = arith.constant 0 : i32
    %c0_i32_0 = arith.constant 0 : i32
    %c0_i32_1 = arith.constant 0 : i32
    return %c0_i32, %c0_i32_0 : i32, i32
  }
  func.func @transform_2(%arg0: i32, %arg1: i32) -> (i32, i32) {
    %c0_i32 = arith.constant 0 : i32
    %c0_i32_0 = arith.constant 0 : i32
    %c0_i32_1 = arith.constant 0 : i32
    return %c0_i32, %c0_i32_0 : i32, i32
  }
  func.func @transform_3(%arg0: i32, %arg1: i32) -> (i32, i32) {
    %c0_i32 = arith.constant 0 : i32
    %c0_i32_0 = arith.constant 0 : i32
    %c0_i32_1 = arith.constant 0 : i32
    return %c0_i32, %c0_i32_0 : i32, i32
  }
  func.func @transform_4(%arg0: i32, %arg1: i32) -> (i32, i32, i32) {
    %c0_i32 = arith.constant 0 : i32
    %c0_i32_0 = arith.constant 0 : i32
    return %arg0, %arg1, %c0_i32 : i32, i32, i32
  }
}

</mosaic_0001>

<bundles_post_ra>
// kernel: tpu_custom_call.1
= control target key start
LH: loop header
LB: loop body
LE: loop exit
PB: predicated region body
PF: predicated region fallthrough
CT: control target
= control target key end

     0   :  { %s664_s15 = smov 0   ;;  %s666_s16 = smov 0   ;;  %s736_s0 = inlined_call_operand.vmem [shape: f32[2,16,4], index: 0, kind: input, shape index: {}]   ;;  %s737_s1 = inlined_call_operand.vmem [shape: f32[4,16], index: 1, kind: input, shape index: {}]   ;;  %s738_s2 = inlined_call_operand.vmem [shape: f32[4,16], index: 2, kind: input, shape index: {}]   ;;  %s739_s3 = inlined_call_operand.vmem [shape: f32[1,16], index: 3, kind: input, shape index: {}]   ;;  %s740_s4 = inlined_call_operand.vmem [shape: f32[2,16,12], index: 4, kind: output, shape index: {}]  }
   0x1   :  { %s668_s17 = smov 0   ;;  %s670_s18 = smov 0  }
   0x2   :  { %s672_s19 = smov 0  }
   0x3 LB: > { %s23_s20 = sadd.s32 1, %s624_s17  ;;  %s26_s21 = sadd.s32 1, %s628_s18  ;;  %s632_s19 = sphi %s672_s19, %s14_s19   ;;  %s628_s18 = sphi %s670_s18, %s744_s18   ;;  %s624_s17 = sphi %s668_s17, %s743_s17   ;;  %s620_s16 = sphi %s666_s16, %s742_s16   ;;  %s616_s15 = sphi %s664_s15, %s741_s15  }
   0x4   : > { %p24_p0 = scmp.ge.s32.totalorder %s23_s20, 2  ;;  %p515_p1 = scmp.ge.s32.totalorder %s632_s19, 1 }
   0x5   : > { %p181_p2 = scmp.lt.s32.totalorder %s632_s19, 5 }
   0x6   : > { %s746_s20 = smov (%p24_p0, %s23_s20), 0  ;;  %s748_s21 = smov (!%p24_p0, %s26_s21), %s628_s18 }
   0x7   : > { %p182_p3 = pnand %p515_p1, %p181_p2  ;;  %p28_p4 = scmp.ge.s32.totalorder %s748_s21, 2 }
   0x8   : > { %p213_p5 = scmp.lt.s32.totalorder (!%p182_p3), %s620_s16, 1  ;;  %p215_p6 = scmp.lt.s32.totalorder (!%p182_p3), %s616_s15, 1 }
   0x9   : > { %s750_s21 = smov (%p28_p4, %s748_s21), 0  ;;  %185 = sbr.rel (%p182_p3) target bundleno = 495 (0x1ef), region = 36 }
   0xa   : > { %p524_p7 = scmp.ne.s32.totalorder (!%p182_p3), %s616_s15, 0 }
   0xe   : > { %v230_v0 = vld [vmem:[%s737_s1] sm:$0xf]  ;;  %vm235_vm0 = vcmask 1043456   ;;  %v634_v1 = vmov 0.0   ;;  %vm635_vm1 = vmmov 0   ;;  %s752_s16 = smov (!%p213_p5, %s620_s16), 1 }
   0xf   : > { %533 = vmatprep.subr.mxu0 %v634_v1  ;;  %538 = vmatprep.subr.mxu1 %v634_v1  ;;  %v309_v2 = vld [vmem:[%s738_s2] sm:$0xf]  ;;  %s216_s26 = scalar_select %p215_p6, %s616_s15, 1  ;;  %vm231_vm2 = vcmask 31744  }
  0x10   : > { %534 = vmatpush3.msk.msra.mxu0 %vm235_vm0, %v230_v0  ;;  %535 = vmatprep.mubr.msk.f32.mxu0 %vm635_vm1, %v634_v1  ;;  %s516_s27 = sshll.u32 %s752_s16, 1 }
  0x11   : > { %539 = vmatpush3.msk.msra.mxu1 %vm235_vm0, %v309_v2  ;;  %540 = vmatprep.mubr.msk.f32.mxu1 %vm635_vm1, %v634_v1  ;;  %s218_s28 = sadd.s32 %s516_s27, %s216_s26 }
  0x12   : > { %s517_s29 = sshll.u32 %s218_s28, 3 }
  0x13   : > { %s220_s6 = scalar_lea.vmem %s736_s0, %s517_s29  ;;  %s710_s9 = scalar_lea.vmem %s740_s4, %s517_s29 }
  0x14   : > { %v229_v3 = vld [vmem:[%s220_s6] sm:$0xff] }
  0x15   : > { %536 = vmatmul.mubr.msk.f32.vlgmr.msra.gmra.mxu0 %vm231_vm2, %v229_v3  ;;  %541 = vmatmul.mubr.msk.f32.vlgmr.msra.gmra.mxu1 %vm231_vm2, %v229_v3 }
  0xd3   : > { %386 = sbr.rel (%p524_p7) target bundleno = 218 (0xda), region = 40 }
  0xd5   : > { %v305_v4 = vpop.f32.mrf.mxu0  ;;  %v379_v5 = vpop.f32.mrf.mxu1 }
  0xd7   : > { %v537_v6 = vpop.f32.mrf.mxu0  ;;  %v542_v7 = vpop.f32.mrf.mxu1 }
  0xd8   : > { %vm387_vm3 = vcmask 122880   ;;  %v636_v8 = vmov 0.0  }
  0xd9   : > { %388 = vst.msk [vmem:[#allocation2] sm:$0x1] %vm387_vm3, %v636_v8 }
  0xda PF: > { %v391_v10 = vrot.slane %v305_v4, 7  ;;  %vm393_vm4 = vcmask 1040384   ;;  %vm395_vm5 = vcmask 122880   ;;  %418 = vst.msk [vmem:[%s710_s9] sm:$0xff] %vm231_vm2, %v229_v3  ;;  %v525_v12 = vld [vmem:[%s739_s3] ss:$0 sm:$0xff] }
  0xdb   : > { %s637_s12 = smov 120   ;;  %s638_s13 = smov 4   ;;  %vm423_vm6 = vcmask 97312  }
  0xe0   : > { %v389_v9 = vld [vmem:[#allocation2] sm:$0x1] }
  0xe1   : > { %v394_v11 = vsel %vm393_vm4, %v389_v9, %v391_v10  ;;  %396 = vst.msk [vmem:[#allocation2] sm:$0x1] %vm395_vm5, %v391_v10 }
  0xe2   : > { %v397_v13 = vadd.f32 %v394_v11, %v379_v5 }
  0xe4   : > { %v405_v14 = vadd.f32 %v525_v12, %v397_v13 }
  0xe6   : > { %v526_v15 = vmul.f32 -1.442695, %v405_v14 }
  0xe8   : > { %588 = vpow2.f32 %v526_v15 }
  0xf5   : > { %v589_v16 = vpop.eup %588 }
  0xf6   : > { %v410_v17 = vadd.f32 1.0, %v589_v16 }
  0xf8   : > { %590 = vrcp.f32 %v410_v17 }
  0xf9   : > { %592 = vtanh.f32 %v405_v14 }
 0x105   : > { %v591_v18 = vpop.eup %590 }
 0x106   : > { %414 = vrot.lane.b32.xlu0 %v591_v18, %s637_s12  ;;  %v593_v19 = vpop.eup %592 }
 0x178   : > { %v415_v20 = vpop.permute.xlu0 %414 }
 0x179   : > { %v417_v21 = vmul.f32 %v593_v19, %v415_v20 }
 0x17b   : > { %420 = vrot.lane.b32.xlu0 %v417_v21, %s638_s13 }
 0x1ed   : > { %v421_v22 = vpop.permute.xlu0 %420 }
 0x1ee   : > { %424 = vst.msk [vmem:[%s710_s9] sm:$0xff] %vm423_vm6, %v421_v22 }
 0x1ef PF: > { %s14_s19 = sadd.s32 1, %s632_s19   ;;  %s741_s15 = smov %s624_s17 }
 0x1f0   : > { %p11_p8 = scmp.ge.s32.totalorder %s14_s19, 6   ;;  %s742_s16 = smov %s628_s18 }
 0x1f1   : > { %s743_s17 = smov %s746_s20  ;;  %s744_s18 = smov %s750_s21 }
 0x1f2   :  { %13 = sbr.rel (!%p11_p8) target bundleno = 3 (0x3), region = 70 }

</bundles_post_ra>
